<compile_context>
chip_gen: v6e
topology: v6e:2x2x1
jax: 0.10.0
libtpu: 0.0.40
codegen_flags: <defaults>
</compile_context>

<pallas_src>
import jax
import jax.numpy as jnp
from jax.experimental import pallas as pl
from jax.experimental.pallas import tpu as pltpu


def _afs_fused_kernel(x_ref, w1_ref, b1_ref, w2_ref, b2_ref, pool_ref, o_ref):
    """One grid step == one batch tile of tb images (both channel groups fused).

    x_ref   : (C, tb*HW)        bf16  channel-major activations, lanes = tb*HW
    w1_ref  : (G*Cmid, C)       bf16  block-diagonal conv1 weights (BN1 folded)
    b1_ref  : (G*Cmid, 1)       f32   BN1 folded bias
    w2_ref  : (G*Cout, G*Cmid)  bf16  block-diagonal conv2 weights (BN2 folded)
    b2_ref  : (G*Cout, 1)       f32   BN2 folded bias
    pool_ref: (tb*HW, tb)       f32   block average-pool matrix (1/HW entries)
    o_ref   : (1, G*Cout, tb)   f32   pooled outputs for this batch tile
    """
    # conv1 + BN1 + ReLU for both groups at once (block-diagonal weights).
    h1 = jnp.dot(w1_ref[...], x_ref[...], preferred_element_type=jnp.float32)
    h1 = jnp.maximum(h1 + b1_ref[...], 0.0)                      # (G*Cmid, tb*HW)
    # conv2 + BN2 + ReLU.
    h2 = jnp.dot(w2_ref[...], h1.astype(w2_ref.dtype),
                 preferred_element_type=jnp.float32)
    h2 = jnp.maximum(h2 + b2_ref[...], 0.0)                      # (G*Cout, tb*HW)
    # AdaptiveAvgPool2d((1,1)) == per-image mean over the HW lane block,
    # expressed as one small matmul; result is stored directly (no stack/concat).
    o_ref[0] = jnp.dot(h2, pool_ref[...], preferred_element_type=jnp.float32)


def _fold_bn(gamma, beta, mean, var, eps=1e-5):
    """Fold eval-mode BatchNorm2d into per-channel (scale, bias)."""
    scale = gamma / jnp.sqrt(var + eps)
    bias = beta - mean * scale
    return scale, bias


def make_se_params(key, in_planes, out_planes=3, mid=32):
    """Deterministic SeBlock parameters: two 1x1 convs + two BatchNorms."""
    k = jax.random.split(key, 8)
    # conv weights stored as matmul weights: (Cin, Cout)
    w1 = jax.random.normal(k[0], (in_planes, mid), jnp.float32) * 0.1
    w2 = jax.random.normal(k[1], (mid, out_planes), jnp.float32) * 0.1
    g1 = 1.0 + 0.1 * jax.random.normal(k[2], (mid,), jnp.float32)
    b1 = 0.1 * jax.random.normal(k[3], (mid,), jnp.float32)
    m1 = 0.05 * jax.random.normal(k[4], (mid,), jnp.float32)
    v1 = jnp.abs(jax.random.normal(k[5], (mid,), jnp.float32)) + 0.5
    g2 = 1.0 + 0.1 * jax.random.normal(k[6], (out_planes,), jnp.float32)
    b2 = 0.1 * jax.random.normal(k[7], (out_planes,), jnp.float32)
    m2 = jnp.zeros((out_planes,), jnp.float32)
    v2 = jnp.ones((out_planes,), jnp.float32)
    s1, bb1 = _fold_bn(g1, b1, m1, v1)
    s2, bb2 = _fold_bn(g2, b2, m2, v2)
    return dict(
        w1=w1, s1=s1.reshape(1, -1), b1=bb1.reshape(1, -1),
        w2=w2, s2=s2.reshape(1, -1), b2=bb2.reshape(1, -1),
    )


def afs_block_forward(x_nchw, params, split_channels):
    """x_nchw: (B, C, H, W) float32 -> (B, G*Cout, 1, 1), matching the module."""
    b, c, h, w = x_nchw.shape
    hw = h * w
    n_grp = len(split_channels)
    cmid = params[0]["w1"].shape[1]
    cout = params[0]["w2"].shape[1]

    # ---- block-diagonal folded weights (handles uneven splits for free) ------
    w1_bd = jnp.zeros((n_grp * cmid, c), jnp.float32)
    w2_bd = jnp.zeros((n_grp * cout, n_grp * cmid), jnp.float32)
    b1_bd, b2_bd = [], []
    start = 0
    for g, cg in enumerate(split_channels):
        p = params[g]
        w1f = (p["w1"] * p["s1"]).T                                # (Cmid, Cg)
        w2f = (p["w2"] * p["s2"]).T                                # (Cout, Cmid)
        w1_bd = w1_bd.at[g * cmid:(g + 1) * cmid, start:start + cg].set(w1f)
        w2_bd = w2_bd.at[g * cout:(g + 1) * cout, g * cmid:(g + 1) * cmid].set(w2f)
        b1_bd.append(p["b1"].reshape(-1, 1))
        b2_bd.append(p["b2"].reshape(-1, 1))
        start += cg
    b1_bd = jnp.concatenate(b1_bd, axis=0)                         # (G*Cmid, 1)
    b2_bd = jnp.concatenate(b2_bd, axis=0)                         # (G*Cout, 1)

    # ---- batch tiling: >= 2 grid steps whenever B >= 2 (v7x has 2 TCs) -------
    # tb is purely for step-overhead amortization; blocks are KB-scale vs
    # tens-of-MiB VMEM on every generation, so no v7x-specific shrinking.
    tb = max(1, min(32, (b + 1) // 2))
    num_tiles = pl.cdiv(b, tb)
    b_pad = num_tiles * tb
    n_lane = tb * hw

    # ---- activations: (B,C,H,W) -> (C, B_pad*HW) bf16 (one XLA transpose) ----
    xg = x_nchw.astype(jnp.bfloat16).reshape(b, c, hw).transpose(1, 0, 2)
    if b_pad != b:
        xg = jnp.pad(xg, ((0, 0), (0, b_pad - b), (0, 0)))          # zero rows,
    xg = xg.reshape(c, b_pad * hw)                                  # sliced off below

    # ---- block average-pool matrix: column t averages lanes [t*HW,(t+1)*HW) --
    row = jax.lax.broadcasted_iota(jnp.int32, (n_lane, tb), 0)
    col = jax.lax.broadcasted_iota(jnp.int32, (n_lane, tb), 1)
    pool = jnp.where(row // hw == col, 1.0 / hw, 0.0).astype(jnp.float32)

    out = pl.pallas_call(
        _afs_fused_kernel,
        out_shape=jax.ShapeDtypeStruct((num_tiles, n_grp * cout, tb), jnp.float32),
        grid_spec=pltpu.PrefetchScalarGridSpec(
            num_scalar_prefetch=0,
            grid=(num_tiles,),
            in_specs=[
                pl.BlockSpec((c, n_lane), lambda i: (0, i)),
                pl.BlockSpec((n_grp * cmid, c), lambda i: (0, 0)),
                pl.BlockSpec((n_grp * cmid, 1), lambda i: (0, 0)),
                pl.BlockSpec((n_grp * cout, n_grp * cmid), lambda i: (0, 0)),
                pl.BlockSpec((n_grp * cout, 1), lambda i: (0, 0)),
                pl.BlockSpec((n_lane, tb), lambda i: (0, 0)),
            ],
            # Each step writes its own output block -> safe "parallel" sharding.
            out_specs=pl.BlockSpec((1, n_grp * cout, tb), lambda i: (i, 0, 0)),
        ),
        compiler_params=pltpu.CompilerParams(
            dimension_semantics=("parallel",)),
    )(xg, w1_bd.astype(jnp.bfloat16), b1_bd,
      w2_bd.astype(jnp.bfloat16), b2_bd, pool)

    # (num_tiles, G*Cout, tb) -> (B, G*Cout, 1, 1); drop batch padding.
    out = out.transpose(0, 2, 1).reshape(b_pad, n_grp * cout)[:b]
    return out.reshape(b, n_grp * cout, 1, 1)


def afs_block_reference(x_nchw, params, split_channels):
    """Pure-JAX f32 reference for validation (matches the PyTorch module)."""
    b, c, h, w = x_nchw.shape
    outs = []
    start = 0
    for g, cg in enumerate(split_channels):
        xg = x_nchw[:, start:start + cg, :, :]
        start += cg
        xg = jnp.transpose(xg, (0, 2, 3, 1)).reshape(b, h * w, cg)
        p = params[g]
        h1 = jnp.maximum(jnp.einsum("bnc,cm->bnm", xg, p["w1"]) * p["s1"] + p["b1"], 0.0)
        h2 = jnp.maximum(jnp.einsum("bnm,mo->bno", h1, p["w2"]) * p["s2"] + p["b2"], 0.0)
        outs.append(jnp.mean(h2, axis=1))
    return jnp.concatenate(outs, axis=1).reshape(b, -1, 1, 1)


if __name__ == "__main__":
    def run_case(key, B, C, H, W, groups=2, out_planes=3, mid=32):
        split_channels = [C // groups for _ in range(groups)]
        split_channels[0] += C - sum(split_channels)
        keys = jax.random.split(key, groups + 1)
        x = jax.random.normal(keys[0], (B, C, H, W), jnp.float32)
        params = [make_se_params(keys[g + 1], split_channels[g],
                                 out_planes=out_planes, mid=mid)
                  for g in range(groups)]
        out = afs_block_forward(x, params, split_channels)
        out = jax.block_until_ready(out)
        ref = afs_block_reference(x, params, split_channels)
        assert out.shape == (B, groups * out_planes, 1, 1), out.shape
        err = float(jnp.max(jnp.abs(out - ref)))
        # bf16 activation/weight path vs f32 reference.
        assert err < 2e-2, f"max abs err {err}"

    key = jax.random.PRNGKey(0)
    k1, k2 = jax.random.split(key)
    # Primary shapes implied by the module: batch=2, channels=4, spatial=16.
    run_case(k1, B=2, C=4, H=16, W=16)
    # Uneven channel split + batch-padding path (flagged correctness concern).
    run_case(k2, B=3, C=5, H=16, W=16)

    # TODO(synk): self.dp_pool (DPBlock) is constructed in __init__ but never
    # used in AFSBlock.forward, so it is intentionally not implemented here.
    print("KERNEL_OK")
</pallas_src>

<mosaic_0001>
module attributes {stable_mosaic.version = 11 : i64} {
  func.func @_afs_fused_kernel(%arg0: i32, %arg1: memref<4x256xbf16, #tpu.memory_space<vmem>>, %arg2: memref<64x4xbf16, #tpu.memory_space<vmem>>, %arg3: memref<64x1xf32, #tpu.memory_space<vmem>>, %arg4: memref<6x64xbf16, #tpu.memory_space<vmem>>, %arg5: memref<6x1xf32, #tpu.memory_space<vmem>>, %arg6: memref<256x1xf32, #tpu.memory_space<vmem>>, %arg7: memref<1x6x1xf32, #tpu.memory_space<vmem>>) attributes {dimension_semantics = [#tpu.dimension_semantics<parallel>], iteration_bounds = array<i64: 2>, scalar_prefetch = 0 : i64, scratch_operands = 0 : i64, tpu.core_type = #tpu.core_type<tc>, window_params = [{transform_indices = @transform_0, window_bounds = array<i64: 4, 256>}, {pipeline_mode = #tpu.pipeline_mode<synchronous>, transform_indices = @transform_1, window_bounds = array<i64: 64, 4>}, {pipeline_mode = #tpu.pipeline_mode<synchronous>, transform_indices = @transform_2, window_bounds = array<i64: 64, 1>}, {pipeline_mode = #tpu.pipeline_mode<synchronous>, transform_indices = @transform_3, window_bounds = array<i64: 6, 64>}, {pipeline_mode = #tpu.pipeline_mode<synchronous>, transform_indices = @transform_4, window_bounds = array<i64: 6, 1>}, {pipeline_mode = #tpu.pipeline_mode<synchronous>, transform_indices = @transform_5, window_bounds = array<i64: 256, 1>}, {transform_indices = @transform_6, window_bounds = array<i64: 1, 6, 1>}]} {
    %c0 = arith.constant 0 : index
    %c0_0 = arith.constant 0 : index
    %0 = vector.load %arg2[%c0, %c0_0] : memref<64x4xbf16, #tpu.memory_space<vmem>>, vector<64x4xbf16>
    %c0_1 = arith.constant 0 : index
    %c0_2 = arith.constant 0 : index
    %1 = vector.load %arg1[%c0_1, %c0_2] : memref<4x256xbf16, #tpu.memory_space<vmem>>, vector<4x256xbf16>
    %cst = arith.constant dense<0.000000e+00> : vector<64x256xf32>
    %2 = tpu.matmul %0, %1, %cst {dimension_numbers = #tpu.dot_dimension_numbers<[1], [0], [0], [1], [0, 0, 1, 1], [], []>} : vector<64x4xbf16>, vector<4x256xbf16>, vector<64x256xf32> -> vector<64x256xf32>
    %c0_3 = arith.constant 0 : index
    %c0_4 = arith.constant 0 : index
    %3 = vector.load %arg3[%c0_3, %c0_4] : memref<64x1xf32, #tpu.memory_space<vmem>>, vector<64x1xf32>
    %4 = vector.broadcast %3 : vector<64x1xf32> to vector<64x256xf32>
    %5 = arith.addf %2, %4 : vector<64x256xf32>
    %cst_5 = arith.constant 0.000000e+00 : f32
    %6 = vector.broadcast %cst_5 : f32 to vector<64x256xf32>
    %7 = arith.maximumf %5, %6 : vector<64x256xf32>
    %c0_6 = arith.constant 0 : index
    %c0_7 = arith.constant 0 : index
    %8 = vector.load %arg4[%c0_6, %c0_7] : memref<6x64xbf16, #tpu.memory_space<vmem>>, vector<6x64xbf16>
    %9 = arith.truncf %7 : vector<64x256xf32> to vector<64x256xbf16>
    %cst_8 = arith.constant dense<0.000000e+00> : vector<6x256xf32>
    %10 = tpu.matmul %8, %9, %cst_8 {dimension_numbers = #tpu.dot_dimension_numbers<[1], [0], [0], [1], [0, 0, 1, 1], [], []>} : vector<6x64xbf16>, vector<64x256xbf16>, vector<6x256xf32> -> vector<6x256xf32>
    %c0_9 = arith.constant 0 : index
    %c0_10 = arith.constant 0 : index
    %11 = vector.load %arg5[%c0_9, %c0_10] : memref<6x1xf32, #tpu.memory_space<vmem>>, vector<6x1xf32>
    %12 = vector.broadcast %11 : vector<6x1xf32> to vector<6x256xf32>
    %13 = arith.addf %10, %12 : vector<6x256xf32>
    %cst_11 = arith.constant 0.000000e+00 : f32
    %14 = vector.broadcast %cst_11 : f32 to vector<6x256xf32>
    %15 = arith.maximumf %13, %14 : vector<6x256xf32>
    %c0_12 = arith.constant 0 : index
    %c0_13 = arith.constant 0 : index
    %16 = vector.load %arg6[%c0_12, %c0_13] : memref<256x1xf32, #tpu.memory_space<vmem>>, vector<256x1xf32>
    %cst_14 = arith.constant dense<0.000000e+00> : vector<6x1xf32>
    %17 = tpu.matmul %15, %16, %cst_14 {dimension_numbers = #tpu.dot_dimension_numbers<[1], [0], [0], [1], [0, 0, 1, 1], [], []>} : vector<6x256xf32>, vector<256x1xf32>, vector<6x1xf32> -> vector<6x1xf32>
    %c0_15 = arith.constant 0 : index
    %c0_16 = arith.constant 0 : index
    %c0_17 = arith.constant 0 : index
    %18 = vector.load %arg7[%c0_15, %c0_16, %c0_17] : memref<1x6x1xf32, #tpu.memory_space<vmem>>, vector<1x6x1xf32>
    %19 = vector.shape_cast %18 : vector<1x6x1xf32> to vector<6x1xf32>
    %20 = vector.shape_cast %17 : vector<6x1xf32> to vector<1x6x1xf32>
    tpu.vector_store %arg7[%c0_15, %c0_16, %c0_17], %20 {strides = array<i32>} : memref<1x6x1xf32, #tpu.memory_space<vmem>>, vector<1x6x1xf32>,
    return
  }
  func.func @transform_0(%arg0: i32) -> (i32, i32) {
    %c0_i32 = arith.constant 0 : i32
    %c0_i32_0 = arith.constant 0 : i32
    return %c0_i32, %arg0 : i32, i32
  }
  func.func @transform_1(%arg0: i32) -> (i32, i32) {
    %c0_i32 = arith.constant 0 : i32
    %c0_i32_0 = arith.constant 0 : i32
    %c0_i32_1 = arith.constant 0 : i32
    return %c0_i32, %c0_i32_0 : i32, i32
  }
  func.func @transform_2(%arg0: i32) -> (i32, i32) {
    %c0_i32 = arith.constant 0 : i32
    %c0_i32_0 = arith.constant 0 : i32
    %c0_i32_1 = arith.constant 0 : i32
    return %c0_i32, %c0_i32_0 : i32, i32
  }
  func.func @transform_3(%arg0: i32) -> (i32, i32) {
    %c0_i32 = arith.constant 0 : i32
    %c0_i32_0 = arith.constant 0 : i32
    %c0_i32_1 = arith.constant 0 : i32
    return %c0_i32, %c0_i32_0 : i32, i32
  }
  func.func @transform_4(%arg0: i32) -> (i32, i32) {
    %c0_i32 = arith.constant 0 : i32
    %c0_i32_0 = arith.constant 0 : i32
    %c0_i32_1 = arith.constant 0 : i32
    return %c0_i32, %c0_i32_0 : i32, i32
  }
  func.func @transform_5(%arg0: i32) -> (i32, i32) {
    %c0_i32 = arith.constant 0 : i32
    %c0_i32_0 = arith.constant 0 : i32
    %c0_i32_1 = arith.constant 0 : i32
    return %c0_i32, %c0_i32_0 : i32, i32
  }
  func.func @transform_6(%arg0: i32) -> (i32, i32, i32) {
    %c0_i32 = arith.constant 0 : i32
    %c0_i32_0 = arith.constant 0 : i32
    %c0_i32_1 = arith.constant 0 : i32
    return %arg0, %c0_i32, %c0_i32_0 : i32, i32, i32
  }
}

</mosaic_0001>

<bundles_post_ra>
// kernel: tpu_custom_call.1
= control target key start
LH: loop header
LB: loop body
LE: loop exit
PB: predicated region body
PF: predicated region fallthrough
CT: control target
= control target key end

     0   :  { %s782_s21 = smov 0   ;;  %s946_s0 = inlined_call_operand.vmem [shape: bf16[4,512], index: 0, kind: input, shape index: {}]   ;;  %s947_s1 = inlined_call_operand.vmem [shape: bf16[64,4], index: 1, kind: input, shape index: {}]   ;;  %s948_s2 = inlined_call_operand.vmem [shape: f32[64,1], index: 2, kind: input, shape index: {}]   ;;  %s949_s3 = inlined_call_operand.vmem [shape: bf16[6,64], index: 3, kind: input, shape index: {}]   ;;  %s950_s4 = inlined_call_operand.vmem [shape: f32[6,1], index: 4, kind: input, shape index: {}]   ;;  %s951_s5 = inlined_call_operand.vmem [shape: f32[256,1], index: 5, kind: input, shape index: {}]   ;;  %s952_s6 = inlined_call_operand.vmem [shape: f32[2,6,1], index: 6, kind: output, shape index: {}]  }
   0x1 LB: > { %s788_s22 = sadd.s32 4294967295, %s744_s21   ;;  %p671_p0 = scmp.ge.s32.totalorder %s744_s21, 1  ;;  %s744_s21 = sphi %s782_s21, %s16_s21  }
   0x2   : > { %p213_p1 = scmp.lt.s32.totalorder %s744_s21, 3 }
   0x4   : > { %p214_p2 = pnand %p671_p0, %p213_p1 }
   0x5   : > { %s672_s23 = sshll.u32 (!%p214_p2), %s788_s22, 1  ;;  %p248_p4 = scmp.lt.s32.totalorder (!%p214_p2), %s788_s22, 1 }
   0x6   : > { %217 = sbr.rel (%p214_p2) target bundleno = 665 (0x299), region = 44  ;;  %p243_p3 = scmp.lt.s32.totalorder (!%p214_p2), %s672_s23, 3 }
   0xb   : > { %v746_v0 = vmov 0   ;;  %s954_s23 = smov (!%p243_p3, %s672_s23), 3  ;;  %v268_v1 = vld [vmem:[%s948_s2 + $0x30] sm:$0xff]  ;;  %vm352_vm0 = vcmask 1041408   ;;  %v266_v2 = vld [vmem:[%s948_s2 + $0x20] sm:$0xff]  ;;  %v269_v3 = vld [vmem:[%s948_s2 + $0x38] sm:$0xff] }
   0xc   : > { %391 = vmatprep.mubr.bf16.mxu0 %v746_v0  ;;  %732 = vset.pattern.permute.xlu0 %v746_v0  ;;  %s673_s26 = sshll.u32 %s954_s23, 1  ;;  %v267_v5 = vld [vmem:[%s948_s2 + $0x28] sm:$0xff]  ;;  %v734_v8 = vld [vmem:[%s947_s1] sm:$0xff]   ;;  %v264_v9 = vld [vmem:[%s948_s2 + $0x10] sm:$0xff]  ;;  %vm339_vm1 = vcmask 31744   ;;  %vm463_vm2 = vcmask 523264  }
   0xd   : > { %733 = vset.pattern.permute.xlu1 %v746_v0  ;;  %499 = vmatprep.mubr.bf16.mxu1 %v746_v0  ;;  %s246_s7 = scalar_lea.vmem %s946_s0, %s673_s26  ;;  %v265_v10 = vld [vmem:[%s948_s2 + $0x18] sm:$0xff]  ;;  %v262_v11 = vld [vmem:[%s948_s2] sm:$0xff]  ;;  %v263_v12 = vld [vmem:[%s948_s2 + $0x8] sm:$0xff]  ;;  %s956_s22 = smov (!%p248_p4, %s788_s22), 1  ;;  %vm612_vm3 = vcmask 5120  }
   0xe   : > { %302 = vperm.xlu0 %732, %v268_v1   ;;  %292 = vperm.xlu1 %733, %v266_v2   ;;  %v679_v4 = vld.sshfl [vmem:[%s246_s7] sm:$0x33 pattern:$0x76325410]  ;;  %v735_v13 = vld [vmem:[%s947_s1 + $0x8] sm:$0xff]   ;;  %v736_v15 = vld [vmem:[%s947_s1 + $0x10] sm:$0xff]  }
   0xf   : > { %v338_v6 = vcombine.high %v679_v4, %v679_v4  ;;  %v354_v7 = vsel %vm352_vm0, %v679_v4, 0  ;;  %v457_v14 = vld [vmem:[%s950_s4] sm:$0x3f]  ;;  %v737_v16 = vld [vmem:[%s947_s1 + $0x18] sm:$0xff]   ;;  %v540_v19 = vld [vmem:[%s951_s5 + $0xf0] sm:$0xff]  ;;  %s674_s8 = sshll.u32 %s956_s22, 3 }
  0x10   : > { %v541_v17 = vld [vmem:[%s951_s5 + $0xf8] sm:$0xff]  ;;  %v524_v20 = vld [vmem:[%s951_s5 + $0x70] sm:$0xff]  ;;  %v539_v21 = vld [vmem:[%s951_s5 + $0xe8] sm:$0xff]  ;;  %s251_s11 = scalar_lea.vmem %s952_s6, %s674_s8 }
  0x11   : > { %680 = vmatprep.subr.msk.bf16.mxu0 %vm352_vm0, %v338_v6  ;;  %v525_v18 = vld [vmem:[%s951_s5 + $0x78] sm:$0xff]  ;;  %v523_v22 = vld [vmem:[%s951_s5 + $0x68] sm:$0xff]  ;;  %v538_v23 = vld [vmem:[%s951_s5 + $0xe0] sm:$0xff] }
  0x12   : > { %307 = vperm.xlu0 %732, %v269_v3   ;;  %297 = vperm.xlu1 %733, %v267_v5   ;;  %v522_v24 = vld [vmem:[%s951_s5 + $0x60] sm:$0xff]  ;;  %v537_v25 = vld [vmem:[%s951_s5 + $0xd8] sm:$0xff]  ;;  %v536_v27 = vld [vmem:[%s951_s5 + $0xd0] sm:$0xff] }
  0x13   : > { %374 = vmatpush1.bf16.msra.mxu0 %v354_v7  ;;  %v521_v26 = vld [vmem:[%s951_s5 + $0x58] sm:$0xff]  ;;  %v520_v28 = vld [vmem:[%s951_s5 + $0x50] sm:$0xff]  ;;  %v535_v29 = vld [vmem:[%s951_s5 + $0xc8] sm:$0xff] }
  0x14   : > { %688 = vmatprep.subr.mxu0 %v541_v17  ;;  %v519_v30 = vld [vmem:[%s951_s5 + $0x48] sm:$0xff]  ;;  %v534_v31 = vld [vmem:[%s951_s5 + $0xc0] sm:$0xff]  ;;  %v533_v33 = vld [vmem:[%s951_s5 + $0xb8] sm:$0xff] }
  0x15   : > { %v518_v32 = vld [vmem:[%s951_s5 + $0x40] sm:$0xff]  ;;  %v517_v34 = vld [vmem:[%s951_s5 + $0x38] sm:$0xff]  ;;  %v532_v35 = vld [vmem:[%s951_s5 + $0xb0] sm:$0xff] }
  0x16   : > { %282 = vperm.xlu0 %732, %v264_v9   ;;  %681 = vmatmul.mubr.msk.bf16.vlgmr.msra.gmra.mxu0 %vm339_vm1, %v734_v8  ;;  %v516_v36 = vld [vmem:[%s951_s5 + $0x30] sm:$0xff]  ;;  %v531_v37 = vld [vmem:[%s951_s5 + $0xa8] sm:$0xff]  ;;  %v530_v39 = vld [vmem:[%s951_s5 + $0xa0] sm:$0xff] }
  0x17   : > { %287 = vperm.xlu1 %733, %v265_v10   ;;  %401 = vmatprep.mubr.bf16.mxu0 %v746_v0  ;;  %v515_v38 = vld [vmem:[%s951_s5 + $0x28] sm:$0xff]  ;;  %v514_v40 = vld [vmem:[%s951_s5 + $0x20] sm:$0xff]  ;;  %v529_v41 = vld [vmem:[%s951_s5 + $0x98] sm:$0xff] }
  0x18   : > { %689 = vmatpush3.msra.mxu0 %v525_v18 }
  0x19   : > { %690 = vmatprep.subr.mxu0 %v540_v19 }
  0x1a   : > { %272 = vperm.xlu0 %732, %v262_v11   ;;  %691 = vmatpush3.msra.mxu0 %v524_v20 }
  0x1b   : > { %277 = vperm.xlu1 %733, %v263_v12   ;;  %692 = vmatprep.subr.mxu0 %v539_v21 }
  0x1c   : > { %693 = vmatpush3.msra.mxu0 %v523_v22 }
  0x1d   : > { %694 = vmatprep.subr.mxu0 %v538_v23 }
  0x1e   : > { %460 = vperm.xlu0 %732, %v457_v14   ;;  %682 = vmatmul.mubr.msk.bf16.gmra.mxu0 %vm339_vm1, %v735_v13 }
  0x1f   : > { %411 = vmatprep.mubr.bf16.mxu0 %v746_v0  ;;  %695 = vmatpush3.msra.mxu0 %v522_v24 }
  0x20   : > { %696 = vmatprep.subr.mxu0 %v537_v25 }
  0x21   : > { %697 = vmatpush3.msra.mxu0 %v521_v26 }
  0x22   : > { %698 = vmatprep.subr.mxu0 %v536_v27 }
  0x23   : > { %699 = vmatpush3.msra.mxu0 %v520_v28 }
  0x24   : > { %700 = vmatprep.subr.mxu0 %v535_v29 }
  0x25   : > { %701 = vmatpush3.msra.mxu0 %v519_v30 }
  0x26   : > { %683 = vmatmul.mubr.msk.bf16.gmra.mxu0 %vm339_vm1, %v736_v15  ;;  %702 = vmatprep.subr.mxu0 %v534_v31 }
  0x27   : > { %421 = vmatprep.mubr.bf16.mxu0 %v746_v0  ;;  %703 = vmatpush3.msra.mxu0 %v518_v32 }
  0x28   : > { %704 = vmatprep.subr.mxu0 %v533_v33 }
  0x29   : > { %705 = vmatpush3.msra.mxu0 %v517_v34 }
  0x2a   : > { %706 = vmatprep.subr.mxu0 %v532_v35 }
  0x2b   : > { %707 = vmatpush3.msra.mxu0 %v516_v36 }
  0x2c   : > { %708 = vmatprep.subr.mxu0 %v531_v37 }
  0x2d   : > { %709 = vmatpush3.msra.mxu0 %v515_v38 }
  0x2e   : > { %684 = vmatmul.mubr.msk.bf16.gmra.mxu0 %vm339_vm1, %v737_v16  ;;  %710 = vmatprep.subr.mxu0 %v530_v39 }
  0x2f   : > { %711 = vmatpush3.msra.mxu0 %v514_v40 }
  0x30   : > { %712 = vmatprep.subr.mxu0 %v529_v41 }
  0x89   : > { %v293_v51 = vpop.permute.xlu1 %292  ;;  %v303_v53 = vpop.permute.xlu0 %302 }
  0x8d   : > { %v298_v56 = vpop.permute.xlu1 %297  ;;  %v308_v58 = vpop.permute.xlu0 %307 }
  0x91   : > { %v283_v5 = vpop.permute.xlu0 %282 }
  0x92   : > { %v288_v0 = vpop.permute.xlu1 %287 }
  0x95   : > { %v273_v24 = vpop.permute.xlu0 %272 }
  0x96   : > { %v278_v17 = vpop.permute.xlu1 %277 }
  0xd6   : > { %v393_v42 = vpop.f32.mrf.mxu0 }
  0xd7   : > { %v394_v34 = vadd.f32 %v393_v42, %v273_v24  ;;  %v513_v42 = vld [vmem:[%s951_s5 + $0x18] sm:$0xff] }
  0xd8   : > { %v395_v43 = vpop.f32.mrf.mxu0  ;;  %713 = vmatpush3.msra.mxu0 %v513_v42 }
  0xd9   : > { %v396_v27 = vadd.f32 %v395_v43, %v273_v24  ;;  %v432_v40 = vmax.f32 %v394_v34, 0.0  ;;  %v448_v43 = vld [vmem:[%s949_s3] sm:$0x7] }
  0xda   : > { %v397_v44 = vpop.f32.mrf.mxu0 }
  0xdb   : > { %v398_v29 = vadd.f32 %v397_v44, %v278_v17  ;;  %v433_v36 = vmax.f32 %v396_v27, 0.0  ;;  %v528_v44 = vld [vmem:[%s951_s5 + $0x90] sm:$0xff] }
  0xdc   : > { %v399_v45 = vpop.f32.mrf.mxu0  ;;  %714 = vmatprep.subr.mxu0 %v528_v44 }
  0xdd   : > { %v400_v21 = vadd.f32 %v399_v45, %v278_v17  ;;  %v434_v37 = vmax.f32 %v398_v29, 0.0  ;;  %v512_v45 = vld [vmem:[%s951_s5 + $0x10] sm:$0xff] }
  0xde   : > { %v403_v46 = vpop.f32.mrf.mxu0  ;;  %715 = vmatpush3.msra.mxu0 %v512_v45 }
  0xdf   : > { %v404_v25 = vadd.f32 %v403_v46, %v283_v5  ;;  %v435_v32 = vmax.f32 %v400_v21, 0.0  ;;  %v449_v41 = vpack.c.bf16 %v434_v37, %v432_v40  ;;  %v527_v46 = vld [vmem:[%s951_s5 + $0x88] sm:$0xff] }
  0xe0   : > { %v405_v47 = vpop.f32.mrf.mxu0  ;;  %716 = vmatprep.subr.mxu0 %v527_v46 }
  0xe1   : > { %v406_v14 = vadd.f32 %v405_v47, %v283_v5  ;;  %v436_v35 = vmax.f32 %v404_v25, 0.0  ;;  %v450_v39 = vpack.c.bf16 %v435_v32, %v433_v36  ;;  %v511_v47 = vld [vmem:[%s951_s5 + $0x8] sm:$0xff] }
  0xe2   : > { %v407_v48 = vpop.f32.mrf.mxu0  ;;  %717 = vmatpush3.msra.mxu0 %v511_v47 }
  0xe3   : > { %v408_v18 = vadd.f32 %v407_v48, %v288_v0  ;;  %v437_v28 = vmax.f32 %v406_v14, 0.0  ;;  %v526_v48 = vld [vmem:[%s951_s5 + $0x80] sm:$0xff] }
  0xe4   : > { %v409_v49 = vpop.f32.mrf.mxu0  ;;  %718 = vmatprep.subr.mxu0 %v526_v48 }
  0xe5   : > { %v410_v8 = vadd.f32 %v409_v49, %v288_v0  ;;  %v438_v30 = vmax.f32 %v408_v18, 0.0  ;;  %v510_v49 = vld [vmem:[%s951_s5] sm:$0xff] }
  0xe6   : > { %v413_v50 = vpop.f32.mrf.mxu0  ;;  %719 = vmatpush3.msra.mxu0 %v510_v49 }
  0xe7   : > { %v414_v12 = vadd.f32 %v413_v50, %v293_v51  ;;  %v439_v22 = vmax.f32 %v410_v8, 0.0  ;;  %v451_v38 = vpack.c.bf16 %v438_v30, %v436_v35 }
  0xe8   : > { %v415_v52 = vpop.f32.mrf.mxu0 }
  0xe9   : > { %v416_v3 = vadd.f32 %v415_v52, %v293_v51  ;;  %v440_v26 = vmax.f32 %v414_v12, 0.0  ;;  %v452_v33 = vpack.c.bf16 %v439_v22, %v437_v28  ;;  %v461_v51 = vpop.permute.xlu0 %460 }
  0xea   : > { %v417_v54 = vpop.f32.mrf.mxu0 }
  0xeb   : > { %v418_v6 = vadd.f32 %v417_v54, %v298_v56  ;;  %v441_v15 = vmax.f32 %v416_v3, 0.0 }
  0xec   : > { %v419_v55 = vpop.f32.mrf.mxu0 }
  0xed   : > { %v420_v61 = vadd.f32 %v419_v55, %v298_v56  ;;  %v442_v19 = vmax.f32 %v418_v6, 0.0 }
  0xee   : > { %v423_v57 = vpop.f32.mrf.mxu0 }
  0xef   : > { %v424_v1 = vadd.f32 %v423_v57, %v303_v53  ;;  %v443_v9 = vmax.f32 %v420_v61, 0.0  ;;  %v453_v31 = vpack.c.bf16 %v442_v19, %v440_v26 }
  0xf0   : > { %v425_v59 = vpop.f32.mrf.mxu0 }
  0xf1   : > { %v426_v62 = vadd.f32 %v425_v59, %v303_v53  ;;  %v444_v13 = vmax.f32 %v424_v1, 0.0  ;;  %v454_v23 = vpack.c.bf16 %v443_v9, %v441_v15 }
  0xf2   : > { %v427_v60 = vpop.f32.mrf.mxu0 }
  0xf3   : > { %v428_v63 = vadd.f32 %v427_v60, %v308_v58  ;;  %v445_v10 = vmax.f32 %v426_v62, 0.0 }
  0xf4   : > { %v429_v2 = vpop.f32.mrf.mxu0 }
  0xf5   : > { %v430_v4 = vadd.f32 %v429_v2, %v308_v58  ;;  %v446_v7 = vmax.f32 %v428_v63, 0.0 }
  0xf7   : > { %v447_v11 = vmax.f32 %v430_v4, 0.0  ;;  %v455_v20 = vpack.c.bf16 %v446_v7, %v444_v13 }
  0xf9   : > { %v456_v16 = vpack.c.bf16 %v447_v11, %v445_v10 }
  0xfb   : > { %475 = vmatprep.subr.bf16.mxu1 %v456_v16 }
  0xfc   : > { %476 = vmatpush1.bf16.msra.mxu1 %v455_v20 }
  0xfd   : > { %477 = vmatprep.subr.bf16.mxu1 %v454_v23 }
 0x100   : > { %478 = vmatpush1.bf16.msra.mxu1 %v453_v31 }
 0x101   : > { %479 = vmatprep.subr.bf16.mxu1 %v452_v33 }
 0x104   : > { %480 = vmatpush1.bf16.msra.mxu1 %v451_v38 }
 0x105   : > { %481 = vmatprep.subr.bf16.mxu1 %v450_v39 }
 0x108   : > { %482 = vmatpush1.bf16.msra.mxu1 %v449_v41 }
 0x10b   : > { %685 = vmatmul.mubr.msk.bf16.vlgmr.msra.gmra.mxu1 %vm463_vm2, %v448_v43 }
 0x1cb   : > { %v501_v50 = vpop.f32.mrf.mxu1 }
 0x1cc   : > { %v502_v52 = vadd.f32 %v501_v50, %v461_v51 }
 0x1cd   : > { %v503_v53 = vpop.f32.mrf.mxu1 }
 0x1ce   : > { %v504_v54 = vadd.f32 %v503_v53, %v461_v51  ;;  %v508_v57 = vmax.f32 %v502_v52, 0.0 }
 0x1cf   : > { %v505_v55 = vpop.f32.mrf.mxu1 }
 0x1d0   : > { %v509_v56 = vmax.f32 %v504_v54, 0.0 }
 0x1d1   : > { %v506_v58 = vpop.f32.mrf.mxu1 }
 0x1d2   : > { %606 = vmatprep.mubr.f32.mxu0 %v509_v56 }
 0x1d3   : > { %607 = vmatmul.mubr.f32.vlgmr.msra.gmra.mxu0 %v508_v57 }
 0x293   : > { %v720_v59 = vpop.f32.mrf.mxu0 }
 0x295   : > { %v721_v60 = vpop.f32.mrf.mxu0 }
 0x296   : > { %v722_v61 = vadd.f32 %v721_v60, %v720_v59 }
 0x298   : > { %613 = vst.msk [vmem:[%s251_s11] sm:$0x3f] %vm612_vm3, %v722_v61 }
 0x299 PF: > { %s16_s21 = sadd.s32 1, %s744_s21  }
 0x29a   : > { %p13_p5 = scmp.ge.s32.totalorder %s16_s21, 4  }
 0x29c   :  { %15 = sbr.rel (!%p13_p5) target bundleno = 1 (0x1), region = 74 }

</bundles_post_ra>
